<compile_context>
chip_gen: v6e
topology: v6e:2x2x1
jax: 0.10.0
libtpu: 0.0.40
codegen_flags: <defaults>
</compile_context>

<pallas_src>
import functools

import jax
import jax.numpy as jnp
from jax import lax
from jax.experimental import pallas as pl
from jax.experimental.pallas import tpu as pltpu


def _mask_generator_kernel(r_row_ref, r_col_ref, out_ref, *,
                           num_tokens: int, mask_len: int):
    """One mask generation.

    r_row_ref: (1, N) int32 random scores (tokens on the lane axis)
    r_col_ref: (N, 1) int32 the same scores (tokens on the sublane axis)
    out_ref:   (1, N) int32 permuted token indices:
               out[0, :mask_len]  = masked tokens, sorted ascending
               out[0, mask_len:]  = unmasked tokens, sorted ascending
    """
    N = num_tokens
    r_row = r_row_ref[...]                                   # (1, N)
    r_col = r_col_ref[...]                                   # (N, 1)

    ii = lax.broadcasted_iota(jnp.int32, (N, N), 0)          # token i (sublane)
    jj = lax.broadcasted_iota(jnp.int32, (N, N), 1)          # token j (lane)

    # precedes[i, j] = token i comes before token j in the random permutation
    # (ascending score, ties broken by index -> strict total order).
    precedes = (r_col < r_row) | ((r_col == r_row) & (ii < jj))     # (N, N) bool

    # Position of each token in the random permutation, in both layouts, read
    # from the SAME matrix (no transpose needed): precedes[j, i] == !precedes[i, j]
    # for i != j.
    rank_row = jnp.sum(precedes.astype(jnp.int32), axis=0, keepdims=True)   # (1, N)
    follows = jnp.logical_and(jnp.logical_not(precedes), ii != jj)
    rank_col = jnp.sum(follows.astype(jnp.int32), axis=1, keepdims=True)    # (N, 1)

    j_row = lax.broadcasted_iota(jnp.int32, (1, N), 1)       # token index as a row
    i_col = lax.broadcasted_iota(jnp.int32, (N, 1), 0)       # token index as a column

    # Composite sort key: masked tokens (perm position < mask_len) keep key=j,
    # unmasked tokens get key=j+N.  Sorting by key gives exactly
    # [sorted(masked), sorted(unmasked)] and all keys are distinct.
    key_row = jnp.where(rank_row < mask_len, j_row, j_row + N)      # (1, N)
    key_col = jnp.where(rank_col < mask_len, i_col, i_col + N)      # (N, 1)

    # Output slot of token i = #{ j : key[j] < key[i] }   (lane reduction).
    slot_col = jnp.sum((key_row < key_col).astype(jnp.int32),
                       axis=1, keepdims=True)                       # (N, 1)

    # Fused "scatter" as a reduction: out[0, p] = i  where slot[i] == p.
    hit = (slot_col == jj)                                          # (N, N) bool
    out_ref[...] = jnp.sum(jnp.where(hit, i_col, 0),
                           axis=0, keepdims=True)                   # (1, N) int32


def mask_generator_batched(num_tokens: int, mask_ratio: float, key, batch: int = 1):
    """Run `batch` independent mask generations in one pallas_call.

    Returns (perm, mask_len) with perm of shape (batch, num_tokens) int32;
    perm[b, :mask_len] are the masked tokens (sorted), perm[b, mask_len:] are
    the unmasked tokens (sorted).
    """
    N = int(num_tokens)
    mask_len = int(N * mask_ratio)

    # Host-side random scores (uniform permutation via argsort-by-score; ties
    # broken by index, bias negligible for 31-bit scores).
    scores = jax.random.randint(key, (batch, N), 0, jnp.iinfo(jnp.int32).max,
                                dtype=jnp.int32)
    scores_row = scores.reshape(batch, 1, N)       # tokens on the lane axis
    scores_col = scores.reshape(batch, N, 1)       # tokens on the sublane axis

    kernel = functools.partial(_mask_generator_kernel,
                               num_tokens=N, mask_len=mask_len)

    perm = pl.pallas_call(
        kernel,
        out_shape=jax.ShapeDtypeStruct((batch, 1, N), jnp.int32),
        grid=(batch,),
        in_specs=[
            pl.BlockSpec((None, 1, N), lambda b: (b, 0, 0)),   # (1, N) in kernel
            pl.BlockSpec((None, N, 1), lambda b: (b, 0, 0)),   # (N, 1) in kernel
        ],
        out_specs=pl.BlockSpec((None, 1, N), lambda b: (b, 0, 0)),  # lane-dense
        compiler_params=pltpu.CompilerParams(
            dimension_semantics=("parallel",)),
    )(scores_row, scores_col)

    return perm[:, 0, :], mask_len


def mask_generator(num_tokens: int, mask_ratio: float, key):
    """Pallas equivalent of MaskGenerator.forward(num_tokens).

    Returns (unmasked_tokens, masked_tokens) as sorted int32 arrays.
    """
    perm, mask_len = mask_generator_batched(num_tokens, mask_ratio, key, batch=1)
    row = perm[0]
    masked_tokens = row[:mask_len]
    unmasked_tokens = row[mask_len:]
    return unmasked_tokens, masked_tokens


def _check_partition(u, m, num_tokens, mask_len):
    u = list(map(int, u))
    m = list(map(int, m))
    assert len(m) == mask_len and len(u) == num_tokens - mask_len
    assert u == sorted(u) and m == sorted(m)                 # both groups sorted
    assert sorted(u + m) == list(range(num_tokens))          # exact partition


if __name__ == "__main__":
    num_tokens = 16          # small "sequence" of tokens
    mask_ratio = 0.75        # MAE-style ratio -> mask_len = 12
    mask_len = int(num_tokens * mask_ratio)

    key = jax.random.PRNGKey(0)

    # Module-equivalent single forward.
    unmasked_tokens, masked_tokens = mask_generator(num_tokens, mask_ratio, key)
    jax.block_until_ready((unmasked_tokens, masked_tokens))
    _check_partition(unmasked_tokens, masked_tokens, num_tokens, mask_len)

    # Batched path: several independent mask generations in one pallas_call
    # (amortizes launch overhead; batch axis marked "parallel").
    perm, ml = mask_generator_batched(num_tokens, mask_ratio,
                                      jax.random.PRNGKey(1), batch=4)
    jax.block_until_ready(perm)
    for b in range(perm.shape[0]):
        _check_partition(perm[b, ml:], perm[b, :ml], num_tokens, ml)

    print("KERNEL_OK")
</pallas_src>

<mosaic_0001>
module attributes {stable_mosaic.version = 11 : i64} {
  func.func @_mask_generator_kernel(%arg0: i32, %arg1: memref<1x1x16xi32, #tpu.memory_space<vmem>>, %arg2: memref<1x16x1xi32, #tpu.memory_space<vmem>>, %arg3: memref<1x1x16xi32, #tpu.memory_space<vmem>>) attributes {dimension_semantics = [#tpu.dimension_semantics<parallel>], iteration_bounds = array<i64: 1>, scalar_prefetch = 0 : i64, scratch_operands = 0 : i64, tpu.core_type = #tpu.core_type<tc>, window_params = [{transform_indices = @transform_0, window_bounds = array<i64: 1, 1, 16>}, {transform_indices = @transform_1, window_bounds = array<i64: 1, 16, 1>}, {transform_indices = @transform_2, window_bounds = array<i64: 1, 1, 16>}]} {
    %c0 = arith.constant 0 : index
    %c0_0 = arith.constant 0 : index
    %c0_1 = arith.constant 0 : index
    %0 = vector.load %arg1[%c0, %c0_0, %c0_1] : memref<1x1x16xi32, #tpu.memory_space<vmem>>, vector<1x1x16xi32>
    %1 = vector.shape_cast %0 : vector<1x1x16xi32> to vector<1x16xi32>
    %c0_2 = arith.constant 0 : index
    %c0_3 = arith.constant 0 : index
    %c0_4 = arith.constant 0 : index
    %2 = vector.load %arg2[%c0_2, %c0_3, %c0_4] : memref<1x16x1xi32, #tpu.memory_space<vmem>>, vector<1x16x1xi32>
    %3 = vector.shape_cast %2 : vector<1x16x1xi32> to vector<16x1xi32>
    %4 = tpu.iota {dimensions = array<i32: 0>} : vector<16x16xi32>
    %5 = tpu.iota {dimensions = array<i32: 1>} : vector<16x16xi32>
    %6 = vector.broadcast %3 : vector<16x1xi32> to vector<16x16xi32>
    %7 = vector.broadcast %1 : vector<1x16xi32> to vector<16x16xi32>
    %8 = arith.cmpi slt, %6, %7 : vector<16x16xi32>
    %9 = vector.broadcast %3 : vector<16x1xi32> to vector<16x16xi32>
    %10 = vector.broadcast %1 : vector<1x16xi32> to vector<16x16xi32>
    %11 = arith.cmpi eq, %9, %10 : vector<16x16xi32>
    %12 = arith.cmpi slt, %4, %5 : vector<16x16xi32>
    %13 = arith.andi %11, %12 : vector<16x16xi1>
    %14 = arith.ori %8, %13 : vector<16x16xi1>
    %15 = arith.extui %14 : vector<16x16xi1> to vector<16x16xi32>
    %cst = arith.constant dense<0> : vector<16xi32>
    %16 = vector.multi_reduction <add>, %15, %cst [0] : vector<16x16xi32> to vector<16xi32>
    %17 = vector.shape_cast %16 : vector<16xi32> to vector<1x16xi32>
    %cst_5 = arith.constant dense<true> : vector<16x16xi1>
    %18 = arith.xori %14, %cst_5 : vector<16x16xi1>
    %19 = arith.cmpi ne, %4, %5 : vector<16x16xi32>
    %20 = arith.andi %18, %19 : vector<16x16xi1>
    %21 = arith.extui %20 : vector<16x16xi1> to vector<16x16xi32>
    %cst_6 = arith.constant dense<0> : vector<16xi32>
    %22 = vector.multi_reduction <add>, %21, %cst_6 [1] : vector<16x16xi32> to vector<16xi32>
    %23 = vector.shape_cast %22 : vector<16xi32> to vector<16x1xi32>
    %24 = tpu.iota {dimensions = array<i32: 1>} : vector<1x16xi32>
    %25 = tpu.iota {dimensions = array<i32: 0>} : vector<16x1xi32>
    %c12_i32 = arith.constant 12 : i32
    %26 = vector.broadcast %c12_i32 : i32 to vector<1x16xi32>
    %27 = arith.cmpi slt, %17, %26 : vector<1x16xi32>
    %c16_i32 = arith.constant 16 : i32
    %28 = vector.broadcast %c16_i32 : i32 to vector<1x16xi32>
    %29 = arith.addi %24, %28 : vector<1x16xi32>
    %30 = arith.select %27, %24, %29 : vector<1x16xi1>, vector<1x16xi32>
    %c12_i32_7 = arith.constant 12 : i32
    %31 = vector.broadcast %c12_i32_7 : i32 to vector<16x1xi32>
    %32 = arith.cmpi slt, %23, %31 : vector<16x1xi32>
    %c16_i32_8 = arith.constant 16 : i32
    %33 = vector.broadcast %c16_i32_8 : i32 to vector<16x1xi32>
    %34 = arith.addi %25, %33 : vector<16x1xi32>
    %35 = arith.select %32, %25, %34 : vector<16x1xi1>, vector<16x1xi32>
    %36 = vector.broadcast %30 : vector<1x16xi32> to vector<16x16xi32>
    %37 = vector.broadcast %35 : vector<16x1xi32> to vector<16x16xi32>
    %38 = arith.cmpi slt, %36, %37 : vector<16x16xi32>
    %39 = arith.extui %38 : vector<16x16xi1> to vector<16x16xi32>
    %cst_9 = arith.constant dense<0> : vector<16xi32>
    %40 = vector.multi_reduction <add>, %39, %cst_9 [1] : vector<16x16xi32> to vector<16xi32>
    %41 = vector.shape_cast %40 : vector<16xi32> to vector<16x1xi32>
    %42 = vector.broadcast %41 : vector<16x1xi32> to vector<16x16xi32>
    %43 = arith.cmpi eq, %42, %5 : vector<16x16xi32>
    %c0_i32 = arith.constant 0 : i32
    %44 = vector.shape_cast %25 : vector<16x1xi32> to vector<16x1xi32>
    %45 = vector.broadcast %44 : vector<16x1xi32> to vector<16x16xi32>
    %46 = vector.broadcast %c0_i32 : i32 to vector<16x16xi32>
    %47 = arith.select %43, %45, %46 : vector<16x16xi1>, vector<16x16xi32>
    %cst_10 = arith.constant dense<0> : vector<16xi32>
    %48 = vector.multi_reduction <add>, %47, %cst_10 [0] : vector<16x16xi32> to vector<16xi32>
    %49 = vector.shape_cast %48 : vector<16xi32> to vector<1x16xi32>
    %c0_11 = arith.constant 0 : index
    %c0_12 = arith.constant 0 : index
    %c0_13 = arith.constant 0 : index
    %50 = vector.load %arg3[%c0_11, %c0_12, %c0_13] : memref<1x1x16xi32, #tpu.memory_space<vmem>>, vector<1x1x16xi32>
    %51 = vector.shape_cast %50 : vector<1x1x16xi32> to vector<1x16xi32>
    %52 = vector.shape_cast %49 : vector<1x16xi32> to vector<1x1x16xi32>
    tpu.vector_store %arg3[%c0_11, %c0_12, %c0_13], %52 {strides = array<i32>} : memref<1x1x16xi32, #tpu.memory_space<vmem>>, vector<1x1x16xi32>,
    return
  }
  func.func @transform_0(%arg0: i32) -> (i32, i32, i32) {
    %c0_i32 = arith.constant 0 : i32
    %c0_i32_0 = arith.constant 0 : i32
    %c0_i32_1 = arith.constant 0 : i32
    return %arg0, %c0_i32, %c0_i32_0 : i32, i32, i32
  }
  func.func @transform_1(%arg0: i32) -> (i32, i32, i32) {
    %c0_i32 = arith.constant 0 : i32
    %c0_i32_0 = arith.constant 0 : i32
    %c0_i32_1 = arith.constant 0 : i32
    return %arg0, %c0_i32, %c0_i32_0 : i32, i32, i32
  }
  func.func @transform_2(%arg0: i32) -> (i32, i32, i32) {
    %c0_i32 = arith.constant 0 : i32
    %c0_i32_0 = arith.constant 0 : i32
    %c0_i32_1 = arith.constant 0 : i32
    return %arg0, %c0_i32, %c0_i32_0 : i32, i32, i32
  }
}

</mosaic_0001>

<bundles_post_ra>
// kernel: tpu_custom_call.1
= control target key start
LH: loop header
LB: loop body
LE: loop exit
PB: predicated region body
PF: predicated region fallthrough
CT: control target
= control target key end

     0   :  { %v181_v1 = vmov 0   ;;  %s251_s0 = inlined_call_operand.vmem [shape: s32[1,1,16], index: 0, kind: input, shape index: {}]   ;;  %s252_s1 = inlined_call_operand.vmem [shape: s32[1,16,1], index: 1, kind: input, shape index: {}]   ;;  %s253_s2 = inlined_call_operand.hbm [shape: s32[1,1,16], index: 2, kind: output, shape index: {}]  }
   0x1   :  { %v13_v0 = vld [vmem:[%s252_s1] sm:$0xff]  ;;  %158 = vset.pattern.permute.xlu0 %v181_v1 }
   0x2   :  { %7 = vsyncpa [#allocation3], 0  ;;  %21 = vperm.xlu0 %158, %v13_v0   ;;  %v14_v2 = vld [vmem:[%s252_s1 + $0x8] sm:$0xff]  ;;  %v15_v3 = vlaneseq  ;;  %v154_v6 = vld [vmem:[%s251_s0] ss:$0 sm:$0xff]  ;;  %vm182_vm7 = vmmov 1  }
   0x3   :  { %vm42_vm12 = vcmask 130048   ;;  %s183_s0 = smov [#allocation2]  }
   0x4   :  { %v206_v4 = vshrl.u32 %v15_v3, 7  ;;  %v208_v5 = vand.u32 127, %v15_v3  ;;  %s146_s1 = sshll.u32 %s183_s0, 4  ;;  %s147_s1 = int_to_ptr.vmem [resolvable:$true] %s146_s1 }
   0x5   :  { %s159_s15 = scalar_lea.vmem %s147_s1, 16  ;;  %s163_s16 = scalar_lea.vmem %s147_s1, 32 }
   0x6   :  { %24 = vperm.xlu0 %158, %v14_v2   ;;  %vm34_vm0 = vcmp.lt.s32.totalorder %v206_v4, %v208_v5  ;;  %v216_v7 = vadd.s32 8, %v206_v4  ;;  %vm54_vm4 = vcmp.ne.s32.totalorder %v206_v4, %v208_v5  ;;  %v91_v38 = vadd.s32 16, %v206_v4  ;;  %p160_p0 = scmp.ne.s32.totalorder %s147_s1, %s159_s15  ;;  %p164_p1 = scmp.lt.s32.totalorder %s147_s1, %s147_s1 }
   0x7   :  { %v87_v40 = vadd.s32 16, %v208_v5  ;;  %p165_p2 = scmp.lt.s32.totalorder %s163_s16, %s159_s15 }
   0x8   :  { %vm35_vm6 = vcmp.lt.s32.totalorder %v216_v7, %v208_v5  ;;  %vm55_vm13 = vcmp.ne.s32.totalorder %v216_v7, %v208_v5  ;;  %v92_v48 = vadd.s32 16, %v216_v7 }
   0x9   :  { %p166_p3 = por %p165_p2, %p164_p1 }
   0xb   :  { %p167_p4 = pnand %p166_p3, %p160_p0 }
  0x7d   :  { %v22_v8 = vpop.permute.xlu0 %21 }
  0x7e   :  { %vm30_vm1 = vcmp.lt.s32.totalorder %v22_v8, %v154_v6  ;;  %vm32_vm2 = vcmp.eq.s32.totalorder %v22_v8, %v154_v6 }
  0x7f   :  { %vm36_vm3 = vmand %vm32_vm2, %vm34_vm0 }
  0x80   :  { %vm38_vm5 = vmor %vm30_vm1, %vm36_vm3 }
  0x81   :  { %vm52_vm8 = vmxor %vm38_vm5, %vm182_vm7  ;;  %v25_v9 = vpop.permute.xlu0 %24  ;;  %v40_v10 = vsel %vm38_vm5, 1, %v181_v1 }
  0x82   :  { %vm31_vm9 = vcmp.lt.s32.totalorder %v25_v9, %v154_v6  ;;  %vm33_vm10 = vcmp.eq.s32.totalorder %v25_v9, %v154_v6  ;;  %vm56_vm11 = vmand %vm52_vm8, %vm54_vm4  ;;  %v43_v16 = vsel %vm42_vm12, %v40_v10, 0 }
  0x83   :  { %vm37_vm14 = vmand %vm33_vm10, %vm35_vm6  ;;  %v58_v11 = vsel %vm56_vm11, 1, %v181_v1 }
  0x84   :  { %vm39_vm15 = vmor %vm31_vm9, %vm37_vm14  ;;  %v60_v12 = vsel %vm42_vm12, %v58_v11, 0  ;;  %vm138_vm9 = vcmask 122880  }
  0x85   :  { %v41_v13 = vsel %vm39_vm15, 1, %v181_v1  ;;  %vm53_vm0 = vmxor %vm39_vm15, %vm182_vm7  ;;  %v62_v14 = vshrl.u32 %v60_v12, 16  ;;  %v61_v15 = vand.u32 65535, %v60_v12 }
  0x86   :  { %v44_v17 = vsel %vm42_vm12, %v41_v13, 0  ;;  %vm57_vm1 = vmand %vm53_vm0, %vm55_vm13 }
  0x87   :  { %v45_v18 = vadd.s32 %v44_v17, %v43_v16  ;;  %v64_v19 = vcvt.s32.f32 %v62_v14  ;;  %v63_v20 = vcvt.s32.f32 %v61_v15  ;;  %v59_v21 = vsel %vm57_vm1, 1, %v181_v1 }
  0x88   :  { %v73_v22 = vsel %vm42_vm12, %v59_v21, 0 }
  0x89   :  { %67 = vadd.xlane.f32.xlu1 %v64_v19  ;;  %65 = vadd.xlane.f32.xlu0 %v63_v20  ;;  %v75_v23 = vshrl.u32 %v73_v22, 16  ;;  %v74_v25 = vand.u32 65535, %v73_v22  ;;  %v46_v27 = vrot.slane %v45_v18, 4 }
  0x8b   :  { %v77_v24 = vcvt.s32.f32 %v75_v23  ;;  %v76_v26 = vcvt.s32.f32 %v74_v25  ;;  %v47_v28 = vadd.s32 %v46_v27, %v45_v18 }
  0x8d   :  { %80 = vadd.xlane.f32.xlu1 %v77_v24  ;;  %v48_v29 = vrot.slane %v47_v28, 2 }
  0x8f   :  { %v49_v30 = vadd.s32 %v48_v29, %v47_v28 }
  0x91   :  { %78 = vadd.xlane.f32.xlu1 %v76_v26  ;;  %v50_v31 = vrot.slane %v49_v30, 1 }
  0x93   :  { %v51_v35 = vadd.s32 %v50_v31, %v49_v30 }
  0x95   :  { %vm86_vm2 = vcmp.lt.s32.totalorder %v51_v35, 12 }
  0x96   :  { %v88_v45 = vsel %vm86_vm2, %v208_v5, %v87_v40 }
 0x112   :  { %v68_v32 = vpop.xlane.xlu1 %67  ;;  %v66_v33 = vpop.xlane.xlu0 %65 }
 0x113   :  { %v70_v34 = vcvt.f32.s32 %v68_v32  ;;  %v69_v37 = vcvt.f32.s32 %v66_v33 }
 0x115   :  { %v71_v36 = vshll.u32 %v70_v34, 16 }
 0x116   :  { %v81_v39 = vpop.xlane.xlu1 %80 }
 0x117   :  { %v72_v41 = vadd.s32 %v71_v36, %v69_v37  ;;  %v83_v42 = vcvt.f32.s32 %v81_v39 }
 0x119   :  { %vm89_vm3 = vcmp.lt.s32.totalorder %v72_v41, 12  ;;  %v84_v46 = vshll.u32 %v83_v42, 16 }
 0x11a   :  { %v93_v43 = vsel %vm89_vm3, %v206_v4, %v91_v38  ;;  %v79_v44 = vpop.xlane.xlu1 %78 }
 0x11b   :  { %v82_v47 = vcvt.f32.s32 %v79_v44  ;;  %vm95_vm4 = vcmp.lt.s32.totalorder %v88_v45, %v93_v43 }
 0x11c   :  { %v97_v49 = vsel %vm95_vm4, 1, %v181_v1 }
 0x11d   :  { %v85_v50 = vadd.s32 %v84_v46, %v82_v47  ;;  %v99_v51 = vsel %vm42_vm12, %v97_v49, 0 }
 0x11e   :  { %v101_v52 = vshrl.u32 %v99_v51, 16  ;;  %v100_v59 = vand.u32 65535, %v99_v51 }
 0x11f   :  { %vm90_vm5 = vcmp.lt.s32.totalorder %v85_v50, 12 }
 0x120   :  { %v94_v53 = vsel %vm90_vm5, %v216_v7, %v92_v48  ;;  %v103_v54 = vcvt.s32.f32 %v101_v52  ;;  %v102_v60 = vcvt.s32.f32 %v100_v59 }
 0x121   :  { %vm96_vm6 = vcmp.lt.s32.totalorder %v88_v45, %v94_v53 }
 0x122   :  { %106 = vadd.xlane.f32.xlu1 %v103_v54  ;;  %v98_v55 = vsel %vm96_vm6, 1, %v181_v1 }
 0x123   :  { %v112_v56 = vsel %vm42_vm12, %v98_v55, 0 }
 0x124   :  { %v114_v57 = vshrl.u32 %v112_v56, 16  ;;  %v113_v61 = vand.u32 65535, %v112_v56 }
 0x126   :  { %v116_v58 = vcvt.s32.f32 %v114_v57  ;;  %v115_v62 = vcvt.s32.f32 %v113_v61 }
 0x128   :  { %119 = vadd.xlane.f32.xlu1 %v116_v58 }
 0x12c   :  { %104 = vadd.xlane.f32.xlu1 %v102_v60 }
 0x130   :  { %117 = vadd.xlane.f32.xlu1 %v115_v62 }
 0x1ab   :  { %v107_v63 = vpop.xlane.xlu1 %106 }
 0x1ac   :  { %v109_v2 = vcvt.f32.s32 %v107_v63 }
 0x1ae   :  { %v110_v6 = vshll.u32 %v109_v2, 16 }
 0x1b1   :  { %v120_v0 = vpop.xlane.xlu1 %119 }
 0x1b2   :  { %v122_v8 = vcvt.f32.s32 %v120_v0 }
 0x1b4   :  { %v123_v11 = vshll.u32 %v122_v8, 16 }
 0x1b5   :  { %v105_v3 = vpop.xlane.xlu1 %104 }
 0x1b6   :  { %v108_v9 = vcvt.f32.s32 %v105_v3 }
 0x1b8   :  { %v111_v10 = vadd.s32 %v110_v6, %v108_v9 }
 0x1b9   :  { %v118_v1 = vpop.xlane.xlu1 %117 }
 0x1ba   :  { %vm125_vm7 = vcmp.eq.s32.totalorder %v111_v10, %v208_v5  ;;  %v121_v12 = vcvt.f32.s32 %v118_v1 }
 0x1bb   :  { %v127_v14 = vsel %vm125_vm7, %v206_v4, 0 }
 0x1bc   :  { %v124_v13 = vadd.s32 %v123_v11, %v121_v12  ;;  %v129_v16 = vsel %vm42_vm12, %v127_v14, 0 }
 0x1be   :  { %vm126_vm8 = vcmp.eq.s32.totalorder %v124_v13, %v208_v5 }
 0x1bf   :  { %v128_v15 = vsel %vm126_vm8, %v216_v7, 0 }
 0x1c0   :  { %v130_v17 = vsel %vm42_vm12, %v128_v15, 0 }
 0x1c1   :  { %v131_v18 = vadd.s32 %v130_v17, %v129_v16 }
 0x1c3   :  { %v132_v19 = vrot.slane %v131_v18, 4 }
 0x1c5   :  { %v133_v20 = vadd.s32 %v132_v19, %v131_v18 }
 0x1c7   :  { %v134_v21 = vrot.slane %v133_v20, 2 }
 0x1c9   :  { %v135_v22 = vadd.s32 %v134_v21, %v133_v20 }
 0x1cb   :  { %v136_v23 = vrot.slane %v135_v22, 1 }
 0x1cd   :  { %v137_v24 = vadd.s32 %v136_v23, %v135_v22 }
 0x1cf   :  { %139 = vst.msk [vmem:[#allocation2] sm:$0x1] %vm138_vm9, %v137_v24 }
 0x1d0   :  { %170 = shalt.err (!%p167_p4)
}
 0x1d1   :  { %149 = dma.vmem_to_hbm [thread:$0]  %s147_s1, 16, %s253_s2, [#allocation3]  }
 0x1d2   :  { %179 = dma.done.wait [#allocation3], 16  }
 0x1d3   :  { %180 = vsyncadd [#allocation3], 4294967280 }
 0x1d4   :  { %153 = vsyncpa [#allocation3], 1 }

</bundles_post_ra>
